<compile_context>
chip_gen: v7x
topology: tpu7x:2x2x1
jax: 0.10.0
libtpu: 0.0.40
codegen_flags: <defaults>
</compile_context>

<pallas_src>
import functools

import jax
import jax.numpy as jnp
from jax.experimental import pallas as pl
from jax.experimental.pallas import tpu as pltpu


def _ceil_div(a, b):
    return -(-a // b)


def _vmem_capacity_bytes():
    """Physical VMEM per TensorCore (device-aware budget), with a safe default."""
    try:
        info = pltpu.get_tpu_info()
        cap = int(getattr(info, "vmem_capacity_bytes", 0) or 0)
        if cap > 0:
            return cap
    except Exception:
        pass
    return 64 * 1024 * 1024  # conservative default: v7x per-core VMEM


def _tensorcores_per_chip():
    """Heuristic TensorCore count behind one grid; only v7x is multi-TC here."""
    try:
        kind = (jax.devices()[0].device_kind or "").lower()
    except Exception:
        return 1
    return 2 if "v7" in kind else 1


# ---------------------------------------------------------------------------
# conv_du gate (two 1x1 convs + ReLU + sigmoid) in (Nb, C, 1) keepdims layout.
# Cr = C // reduction is tiny (2 in the demo), so the "matmuls" are VPU
# broadcast-multiplies plus small reductions -- no MXU padding waste and no
# lane<->sublane relayout of the gate before the final rescale.
# ---------------------------------------------------------------------------
def _conv_du_gate(y, w1, b1, w2t, b2c):
    # y: (Nb, C, 1) f32; w1: (C, Cr); b1: (1, Cr); w2t: (C, Cr); b2c: (C, 1).
    h = jnp.sum(y * w1[None, :, :], axis=1, keepdims=True) + b1[None, :, :]    # (Nb,1,Cr)
    h = jnp.maximum(h, 0.0)
    s = jnp.sum(h * w2t[None, :, :], axis=2, keepdims=True) + b2c[None, :, :]  # (Nb,C,1)
    return jax.nn.sigmoid(s)


# ---------------------------------------------------------------------------
# Resident path: the whole (C, HW) plane(s) of a batch tile live in VMEM.
# ---------------------------------------------------------------------------
def _cca_block_kernel(x_ref, w1_ref, b1_ref, w2t_ref, b2c_ref, o_ref):
    # x block: (Nb, C, HW) with the fused spatial axis lane-dense.
    hw = x_ref.shape[-1]
    inv_hw = 1.0 / float(hw)
    x = x_ref[...]
    # Two-pass (centered) stats: matches the PyTorch reference numerics and is
    # robust to non-zero-centered inputs; f32 temps fuse into the reductions.
    mean = jnp.sum(x.astype(jnp.float32), axis=-1, keepdims=True) * inv_hw     # (Nb,C,1)
    d = x.astype(jnp.float32) - mean
    var = jnp.sum(d * d, axis=-1, keepdims=True) * inv_hw
    y = jnp.sqrt(var) + mean                                                   # contrast + avg-pool
    gate = _conv_du_gate(y, w1_ref[...], b1_ref[...], w2t_ref[...], b2c_ref[...])
    # Rescale straight from the input block (no full f32 copy of x held live).
    o_ref[...] = x * gate.astype(o_ref.dtype)


# ---------------------------------------------------------------------------
# Spatially tiled fallback, pass 1: accumulate per-channel moments over
# 128-lane HW chunks, emit the sigmoid gate on the last chunk.
# ---------------------------------------------------------------------------
def _cca_stats_kernel(x_ref, w1_ref, b1_ref, w2t_ref, b2c_ref, gate_ref,
                      s1_acc, s2_acc, *, hw_total):
    j = pl.program_id(1)

    @pl.when(j == 0)
    def _init():
        s1_acc[...] = jnp.zeros_like(s1_acc)
        s2_acc[...] = jnp.zeros_like(s2_acc)

    hw_t = x_ref.shape[-1]
    xf = x_ref[...].astype(jnp.float32)
    if hw_total % hw_t != 0:
        # ragged trailing chunk: zero out the out-of-bounds lanes before summing
        lane = jax.lax.broadcasted_iota(jnp.int32, xf.shape, 2)
        xf = jnp.where(j * hw_t + lane < hw_total, xf, 0.0)
    s1_acc[...] += jnp.sum(xf, axis=-1, keepdims=True)
    s2_acc[...] += jnp.sum(xf * xf, axis=-1, keepdims=True)

    @pl.when(j == pl.num_programs(1) - 1)
    def _finalize():
        inv_hw = 1.0 / float(hw_total)
        mean = s1_acc[...] * inv_hw
        # TODO(synk): single-pass (clamped) variance here; a Welford-style
        # cross-chunk update would be more robust for large-mean inputs.
        var = jnp.maximum(s2_acc[...] * inv_hw - mean * mean, 0.0)
        y = jnp.sqrt(var) + mean
        gate_ref[...] = _conv_du_gate(y, w1_ref[...], b1_ref[...],
                                      w2t_ref[...], b2c_ref[...])


# Spatially tiled fallback, pass 2: channel-wise rescale.
def _cca_scale_kernel(gate_ref, x_ref, o_ref):
    o_ref[...] = x_ref[...] * gate_ref[...].astype(o_ref.dtype)


# ---------------------------------------------------------------------------
# Wrapper
# ---------------------------------------------------------------------------
def cca_layer(x, w1, b1, w2, b2, *, hw_tile=None):
    """CCA: x * sigmoid(conv_du(stdv_channels(x) + avg_pool(x))).

    x : (N, C, H, W)
    w1: (C, Cr)  -- Conv2d(C, Cr, 1) weight, transposed; Cr = C // reduction
    b1: (Cr,) or (1, Cr)
    w2: (Cr, C)  -- Conv2d(Cr, C, 1) weight, transposed
    b2: (C,) or (1, C)
    hw_tile: force the spatially-tiled path with this chunk size (testing /
             samples whose C*H*W plane does not fit in VMEM).
    """
    N, C, H, W = x.shape
    Cr = w1.shape[-1]
    HW = H * W
    itemsize = jnp.dtype(x.dtype).itemsize

    x_flat = x.reshape(N, C, HW)                              # lane-dense last dim
    w1m = jnp.asarray(w1, jnp.float32).reshape(C, Cr)
    b1m = jnp.asarray(b1, jnp.float32).reshape(1, Cr)
    w2t = jnp.asarray(w2, jnp.float32).reshape(Cr, C).T       # (C, Cr)
    b2c = jnp.asarray(b2, jnp.float32).reshape(C, 1)
    weight_bytes = (3 * C * Cr + Cr + C) * 4

    # ---- device-aware VMEM budget ------------------------------------------
    vmem_cap = _vmem_capacity_bytes()                         # 64 MiB v7x, 128 MiB v5e/v6e
    budget = min(max(vmem_cap // 2, 8 << 20), 64 << 20)

    per_row_bytes = C * HW * itemsize
    # live footprint per batch row: 2x dbl-buffered in + 2x dbl-buffered out
    # + ~2 block-sized f32 temps for the centered stats
    per_row_fp = 4 * per_row_bytes + 2 * C * HW * 4

    spatial = hw_tile is not None and int(hw_tile) < HW
    if not spatial and per_row_fp > budget:
        spatial = True                                        # one sample doesn't fit
        hw_tile = None

    if not spatial:
        # -------- resident path --------------------------------------------
        nb = max(1, min(N, budget // per_row_fp))
        # Megacore split only on multi-TC parts and only if each half still
        # moves a reasonably large block (>= ~512 KiB); v5e/v6e never split.
        tc = _tensorcores_per_chip()
        if tc > 1 and _ceil_div(N, nb) < tc and N >= tc:
            nb_split = _ceil_div(N, tc)
            if nb_split * per_row_bytes >= (512 << 10):
                nb = nb_split
        grid = (_ceil_div(N, nb),)

        est = nb * per_row_fp + weight_bytes + (2 << 20)
        vmem_limit = int(min(max(est * 5 // 4, 32 << 20),
                             max(vmem_cap - (8 << 20), 32 << 20)))

        out_flat = pl.pallas_call(
            _cca_block_kernel,
            out_shape=jax.ShapeDtypeStruct((N, C, HW), x.dtype),
            grid=grid,
            in_specs=[
                pl.BlockSpec((nb, C, HW), lambda i: (i, 0, 0)),
                pl.BlockSpec((C, Cr), lambda i: (0, 0)),
                pl.BlockSpec((1, Cr), lambda i: (0, 0)),
                pl.BlockSpec((C, Cr), lambda i: (0, 0)),
                pl.BlockSpec((C, 1), lambda i: (0, 0)),
            ],
            out_specs=pl.BlockSpec((nb, C, HW), lambda i: (i, 0, 0)),
            compiler_params=pltpu.CompilerParams(
                dimension_semantics=("parallel",),
                vmem_limit_bytes=vmem_limit,
            ),
            cost_estimate=pl.CostEstimate(
                flops=8 * N * C * HW + 4 * N * C * Cr,
                transcendentals=2 * N * C,
                bytes_accessed=2 * N * C * HW * itemsize + weight_bytes,
            ),
        )(x_flat, w1m, b1m, w2t, b2c)
        return out_flat.reshape(N, C, H, W)

    # ------------- spatially tiled fallback (two passes over HBM) ------------
    if hw_tile is None:
        lane_budget = budget // max(1, (4 * itemsize + 8) * C)
        hw_tile = max(128, (lane_budget // 128) * 128)
    hw_tile = int(hw_tile)
    if hw_tile >= HW:
        hw_tile = HW
    else:
        hw_tile = min(max(128, (hw_tile // 128) * 128), HW)   # 128-lane constraint
    n_hw = _ceil_div(HW, hw_tile)

    per_row_chunk = C * hw_tile * itemsize
    per_row_fp_c = 4 * per_row_chunk + 2 * C * hw_tile * 4
    nb = max(1, min(N, budget // max(1, per_row_fp_c)))
    grid = (_ceil_div(N, nb), n_hw)

    est = nb * per_row_fp_c + 4 * nb * C * 4 + weight_bytes + (2 << 20)
    vmem_limit = int(min(max(est * 5 // 4, 32 << 20),
                         max(vmem_cap - (8 << 20), 32 << 20)))

    gate = pl.pallas_call(
        functools.partial(_cca_stats_kernel, hw_total=HW),
        out_shape=jax.ShapeDtypeStruct((N, C, 1), jnp.float32),
        grid=grid,
        in_specs=[
            pl.BlockSpec((nb, C, hw_tile), lambda i, j: (i, 0, j)),
            pl.BlockSpec((C, Cr), lambda i, j: (0, 0)),
            pl.BlockSpec((1, Cr), lambda i, j: (0, 0)),
            pl.BlockSpec((C, Cr), lambda i, j: (0, 0)),
            pl.BlockSpec((C, 1), lambda i, j: (0, 0)),
        ],
        out_specs=pl.BlockSpec((nb, C, 1), lambda i, j: (i, 0, 0)),
        scratch_shapes=[
            pltpu.VMEM((nb, C, 1), jnp.float32),
            pltpu.VMEM((nb, C, 1), jnp.float32),
        ],
        compiler_params=pltpu.CompilerParams(
            dimension_semantics=("parallel", "arbitrary"),
            vmem_limit_bytes=vmem_limit,
        ),
        cost_estimate=pl.CostEstimate(
            flops=4 * N * C * HW,
            transcendentals=2 * N * C,
            bytes_accessed=N * C * HW * itemsize + N * C * 4 + weight_bytes,
        ),
    )(x_flat, w1m, b1m, w2t, b2c)

    out_flat = pl.pallas_call(
        _cca_scale_kernel,
        out_shape=jax.ShapeDtypeStruct((N, C, HW), x.dtype),
        grid=grid,
        in_specs=[
            pl.BlockSpec((nb, C, 1), lambda i, j: (i, 0, 0)),
            pl.BlockSpec((nb, C, hw_tile), lambda i, j: (i, 0, j)),
        ],
        out_specs=pl.BlockSpec((nb, C, hw_tile), lambda i, j: (i, 0, j)),
        compiler_params=pltpu.CompilerParams(
            dimension_semantics=("parallel", "parallel"),
            vmem_limit_bytes=vmem_limit,
        ),
        cost_estimate=pl.CostEstimate(
            flops=N * C * HW,
            transcendentals=0,
            bytes_accessed=2 * N * C * HW * itemsize + N * C * 4,
        ),
    )(gate, x_flat)
    return out_flat.reshape(N, C, H, W)


def cca_reference(x, w1, b1, w2, b2):
    """Pure-JAX reference matching the PyTorch CCALayer semantics."""
    mean = jnp.mean(x, axis=(2, 3), keepdims=True)
    var = jnp.mean((x - mean) ** 2, axis=(2, 3), keepdims=True)
    y = jnp.sqrt(var) + mean                                  # (N, C, 1, 1)
    yv = y[:, :, 0, 0]                                        # (N, C)
    h = jnp.maximum(yv @ w1 + jnp.reshape(b1, (1, -1)), 0.0)  # (N, Cr)
    s = jax.nn.sigmoid(h @ w2 + jnp.reshape(b2, (1, -1)))     # (N, C)
    return x * s[:, :, None, None]


if __name__ == "__main__":
    # Shapes consistent with RFDB2(in_channels=32): CCA runs on dc*2 = 32
    # channels with reduction=16 -> Cr = 2.
    N, C, H, W = 2, 32, 16, 16
    reduction = 16
    Cr = max(1, C // reduction)

    key = jax.random.PRNGKey(0)
    kx, k1, k2, k3, k4 = jax.random.split(key, 5)

    x = jax.random.normal(kx, (N, C, H, W), dtype=jnp.float32)
    # Conv2d(C, Cr, 1) weight is (Cr, C, 1, 1) in torch; stored here transposed
    # as (C, Cr) so the gate does y @ w1. Same convention for the second conv.
    w1 = jax.random.normal(k1, (C, Cr), dtype=jnp.float32) * 0.1
    b1 = jax.random.normal(k2, (1, Cr), dtype=jnp.float32) * 0.1
    w2 = jax.random.normal(k3, (Cr, C), dtype=jnp.float32) * 0.1
    b2 = jax.random.normal(k4, (1, C), dtype=jnp.float32) * 0.1

    ref = cca_reference(x, w1, b1, w2, b2)

    # resident (single-block) path
    out = cca_layer(x, w1, b1, w2, b2)
    jax.block_until_ready(out)
    assert out.shape == x.shape and out.dtype == x.dtype
    assert jnp.allclose(out, ref, atol=1e-4, rtol=1e-4), "mismatch (resident path)"

    # exercise the spatially-tiled fallback (used when one sample's C*H*W
    # plane exceeds the VMEM budget, e.g. large images on v7x's 64 MiB)
    out_tiled = cca_layer(x, w1, b1, w2, b2, hw_tile=128)
    jax.block_until_ready(out_tiled)
    assert jnp.allclose(out_tiled, ref, atol=1e-4, rtol=1e-4), "mismatch (tiled path)"

    # ragged spatial chunk: HW = 144 is not a multiple of the 128-lane tile,
    # exercising the in-kernel lane masking of the moment accumulation.
    H2 = W2 = 12
    x2 = jax.random.normal(kx, (N, C, H2, W2), dtype=jnp.float32)
    ref2 = cca_reference(x2, w1, b1, w2, b2)
    out2 = cca_layer(x2, w1, b1, w2, b2, hw_tile=128)
    jax.block_until_ready(out2)
    assert jnp.allclose(out2, ref2, atol=1e-4, rtol=1e-4), "mismatch (ragged tiled path)"

    print("KERNEL_OK")
</pallas_src>

<mosaic_0001>
module attributes {stable_mosaic.version = 11 : i64} {
  func.func @_cca_block_kernel(%arg0: i32, %arg1: memref<2x32x256xf32, #tpu.memory_space<vmem>>, %arg2: memref<32x2xf32, #tpu.memory_space<vmem>>, %arg3: memref<1x2xf32, #tpu.memory_space<vmem>>, %arg4: memref<32x2xf32, #tpu.memory_space<vmem>>, %arg5: memref<32x1xf32, #tpu.memory_space<vmem>>, %arg6: memref<2x32x256xf32, #tpu.memory_space<vmem>>) attributes {dimension_semantics = [#tpu.dimension_semantics<parallel>], iteration_bounds = array<i64: 1>, scalar_prefetch = 0 : i64, scratch_operands = 0 : i64, tpu.core_type = #tpu.core_type<tc>, window_params = [{transform_indices = @transform_0, window_bounds = array<i64: 2, 32, 256>}, {pipeline_mode = #tpu.pipeline_mode<synchronous>, transform_indices = @transform_1, window_bounds = array<i64: 32, 2>}, {pipeline_mode = #tpu.pipeline_mode<synchronous>, transform_indices = @transform_2, window_bounds = array<i64: 1, 2>}, {pipeline_mode = #tpu.pipeline_mode<synchronous>, transform_indices = @transform_3, window_bounds = array<i64: 32, 2>}, {pipeline_mode = #tpu.pipeline_mode<synchronous>, transform_indices = @transform_4, window_bounds = array<i64: 32, 1>}, {transform_indices = @transform_5, window_bounds = array<i64: 2, 32, 256>}]} {
    %c0 = arith.constant 0 : index
    %c0_0 = arith.constant 0 : index
    %c0_1 = arith.constant 0 : index
    %0 = vector.load %arg1[%c0, %c0_0, %c0_1] : memref<2x32x256xf32, #tpu.memory_space<vmem>>, vector<2x32x256xf32>
    %cst = arith.constant dense<0.000000e+00> : vector<2x32xf32>
    %1 = vector.multi_reduction <add>, %0, %cst [2] : vector<2x32x256xf32> to vector<2x32xf32>
    %2 = vector.shape_cast %1 : vector<2x32xf32> to vector<2x32x1xf32>
    %cst_2 = arith.constant 3.906250e-03 : f32
    %3 = vector.broadcast %cst_2 : f32 to vector<2x32x1xf32>
    %4 = arith.mulf %2, %3 : vector<2x32x1xf32>
    %5 = vector.broadcast %4 : vector<2x32x1xf32> to vector<2x32x256xf32>
    %6 = arith.subf %0, %5 : vector<2x32x256xf32>
    %7 = arith.mulf %6, %6 : vector<2x32x256xf32>
    %cst_3 = arith.constant dense<0.000000e+00> : vector<2x32xf32>
    %8 = vector.multi_reduction <add>, %7, %cst_3 [2] : vector<2x32x256xf32> to vector<2x32xf32>
    %9 = vector.shape_cast %8 : vector<2x32xf32> to vector<2x32x1xf32>
    %cst_4 = arith.constant 3.906250e-03 : f32
    %10 = vector.broadcast %cst_4 : f32 to vector<2x32x1xf32>
    %11 = arith.mulf %9, %10 : vector<2x32x1xf32>
    %12 = math.sqrt %11 : vector<2x32x1xf32>
    %13 = arith.addf %12, %4 : vector<2x32x1xf32>
    %c0_5 = arith.constant 0 : index
    %c0_6 = arith.constant 0 : index
    %14 = vector.load %arg2[%c0_5, %c0_6] : memref<32x2xf32, #tpu.memory_space<vmem>>, vector<32x2xf32>
    %c0_7 = arith.constant 0 : index
    %c0_8 = arith.constant 0 : index
    %15 = vector.load %arg3[%c0_7, %c0_8] : memref<1x2xf32, #tpu.memory_space<vmem>>, vector<1x2xf32>
    %c0_9 = arith.constant 0 : index
    %c0_10 = arith.constant 0 : index
    %16 = vector.load %arg4[%c0_9, %c0_10] : memref<32x2xf32, #tpu.memory_space<vmem>>, vector<32x2xf32>
    %c0_11 = arith.constant 0 : index
    %c0_12 = arith.constant 0 : index
    %17 = vector.load %arg5[%c0_11, %c0_12] : memref<32x1xf32, #tpu.memory_space<vmem>>, vector<32x1xf32>
    %18 = vector.shape_cast %14 : vector<32x2xf32> to vector<1x32x2xf32>
    %19 = vector.broadcast %13 : vector<2x32x1xf32> to vector<2x32x2xf32>
    %20 = vector.broadcast %18 : vector<1x32x2xf32> to vector<2x32x2xf32>
    %21 = arith.mulf %19, %20 : vector<2x32x2xf32>
    %cst_13 = arith.constant dense<0.000000e+00> : vector<2x2xf32>
    %22 = vector.multi_reduction <add>, %21, %cst_13 [1] : vector<2x32x2xf32> to vector<2x2xf32>
    %23 = vector.shape_cast %22 : vector<2x2xf32> to vector<2x1x2xf32>
    %24 = vector.shape_cast %15 : vector<1x2xf32> to vector<1x1x2xf32>
    %25 = vector.broadcast %24 : vector<1x1x2xf32> to vector<2x1x2xf32>
    %26 = arith.addf %23, %25 : vector<2x1x2xf32>
    %cst_14 = arith.constant 0.000000e+00 : f32
    %27 = vector.broadcast %cst_14 : f32 to vector<2x1x2xf32>
    %28 = arith.maximumf %26, %27 : vector<2x1x2xf32>
    %29 = vector.shape_cast %16 : vector<32x2xf32> to vector<1x32x2xf32>
    %30 = vector.broadcast %28 : vector<2x1x2xf32> to vector<2x32x2xf32>
    %31 = vector.broadcast %29 : vector<1x32x2xf32> to vector<2x32x2xf32>
    %32 = arith.mulf %30, %31 : vector<2x32x2xf32>
    %cst_15 = arith.constant dense<0.000000e+00> : vector<2x32xf32>
    %33 = vector.multi_reduction <add>, %32, %cst_15 [2] : vector<2x32x2xf32> to vector<2x32xf32>
    %34 = vector.shape_cast %33 : vector<2x32xf32> to vector<2x32x1xf32>
    %35 = vector.shape_cast %17 : vector<32x1xf32> to vector<1x32x1xf32>
    %36 = vector.broadcast %35 : vector<1x32x1xf32> to vector<2x32x1xf32>
    %37 = arith.addf %34, %36 : vector<2x32x1xf32>
    %38 = arith.negf %37 : vector<2x32x1xf32>
    %39 = math.exp %38 : vector<2x32x1xf32>
    %cst_16 = arith.constant 1.000000e+00 : f32
    %40 = vector.broadcast %cst_16 : f32 to vector<2x32x1xf32>
    %41 = arith.addf %40, %39 : vector<2x32x1xf32>
    %42 = arith.divf %40, %41 : vector<2x32x1xf32>
    %43 = vector.broadcast %42 : vector<2x32x1xf32> to vector<2x32x256xf32>
    %44 = arith.mulf %0, %43 : vector<2x32x256xf32>
    %c0_17 = arith.constant 0 : index
    %c0_18 = arith.constant 0 : index
    %c0_19 = arith.constant 0 : index
    %45 = vector.load %arg6[%c0_17, %c0_18, %c0_19] : memref<2x32x256xf32, #tpu.memory_space<vmem>>, vector<2x32x256xf32>
    tpu.vector_store %arg6[%c0_17, %c0_18, %c0_19], %44 {strides = array<i32>} : memref<2x32x256xf32, #tpu.memory_space<vmem>>, vector<2x32x256xf32>,
    return
  }
  func.func @transform_0(%arg0: i32) -> (i32, i32, i32) {
    %c0_i32 = arith.constant 0 : i32
    %c0_i32_0 = arith.constant 0 : i32
    %c0_i32_1 = arith.constant 0 : i32
    return %arg0, %c0_i32, %c0_i32_0 : i32, i32, i32
  }
  func.func @transform_1(%arg0: i32) -> (i32, i32) {
    %c0_i32 = arith.constant 0 : i32
    %c0_i32_0 = arith.constant 0 : i32
    %c0_i32_1 = arith.constant 0 : i32
    return %c0_i32, %c0_i32_0 : i32, i32
  }
  func.func @transform_2(%arg0: i32) -> (i32, i32) {
    %c0_i32 = arith.constant 0 : i32
    %c0_i32_0 = arith.constant 0 : i32
    %c0_i32_1 = arith.constant 0 : i32
    return %c0_i32, %c0_i32_0 : i32, i32
  }
  func.func @transform_3(%arg0: i32) -> (i32, i32) {
    %c0_i32 = arith.constant 0 : i32
    %c0_i32_0 = arith.constant 0 : i32
    %c0_i32_1 = arith.constant 0 : i32
    return %c0_i32, %c0_i32_0 : i32, i32
  }
  func.func @transform_4(%arg0: i32) -> (i32, i32) {
    %c0_i32 = arith.constant 0 : i32
    %c0_i32_0 = arith.constant 0 : i32
    %c0_i32_1 = arith.constant 0 : i32
    return %c0_i32, %c0_i32_0 : i32, i32
  }
  func.func @transform_5(%arg0: i32) -> (i32, i32, i32) {
    %c0_i32 = arith.constant 0 : i32
    %c0_i32_0 = arith.constant 0 : i32
    %c0_i32_1 = arith.constant 0 : i32
    return %arg0, %c0_i32, %c0_i32_0 : i32, i32, i32
  }
}

</mosaic_0001>

<bundles_post_ra>
// kernel: tpu_custom_call.1
= control target key start
LH: loop header
LB: loop body
LE: loop exit
PB: predicated region body
PF: predicated region fallthrough
CT: control target
= control target key end

     0   :  { %10 = vsyncpa [#allocation3], 0  ;;  %s851_s0 = inlined_call_operand.hbm [shape: f32[2,32,256], index: 0, kind: input, shape index: {}]   ;;  %s852_s1 = inlined_call_operand.vmem [shape: f32[32,2], index: 1, kind: input, shape index: {}]   ;;  %s853_s2 = inlined_call_operand.vmem [shape: f32[1,2], index: 2, kind: input, shape index: {}]   ;;  %s854_s3 = inlined_call_operand.vmem [shape: f32[32,2], index: 3, kind: input, shape index: {}]   ;;  %s855_s4 = inlined_call_operand.vmem [shape: f32[32,1], index: 4, kind: input, shape index: {}]   ;;  %s856_s5 = inlined_call_operand.hbm [shape: f32[2,32,256], index: 5, kind: output, shape index: {}]  }
   0x1   :  { %11 = vsyncpa [#allocation4], 0  ;;  %s559_s18 = smov [#allocation2]   ;;  %s511_s22 = scalar_lea.hbm %s851_s0, 2048 }
   0x2   :  { %s17_s19 = sshll.u32 %s559_s18, 4  ;;  %p512_p0 = scmp.ne.s32.totalorder %s851_s0, %s511_s22  ;;  %s18_s19 = int_to_ptr.vmem [resolvable:$true] %s17_s19 }
   0x3   :  { %p515_p1 = scmp.lt.u32.totalorder %s511_s22, %s851_s0 }
   0x5   :  { %p517_p2 = pnand %p515_p1, %p512_p0 }
   0x7   :  { %520 = shalt.err (!%p517_p2)
}
   0x8   :  { %s521_s27 = scalar_lea.vmem %s18_s19, 2048  ;;  %p526_p4 = scmp.lt.s32.totalorder %s18_s19, %s18_s19 }
   0x9   :  { %p522_p3 = scmp.ne.s32.totalorder %s18_s19, %s521_s27  ;;  %p527_p5 = scmp.lt.s32.totalorder %s521_s27, %s521_s27 }
   0xb   :  { %p528_p6 = por %p527_p5, %p526_p4 }
   0xd   :  { %p529_p7 = pnand %p528_p6, %p522_p3 }
   0xf   :  { %532 = shalt.err (!%p529_p7)
}
  0x10   :  { %s560_s28 = smov 256   ;;  %s561_s29 = smov 16  }
  0x11   :  { %23 = dma.hbm_to_vmem [thread:$0]  %s851_s0, 2048, %s18_s19, [#allocation3], %s560_s28, %s560_s28, %s561_s29  }
  0x12   :  { %555 = dma.done.wait [#allocation3], 2048  }
  0x13   :  { %556 = vsyncadd [#allocation3], 4294965248  ;;  %v609_v0 = vld [vmem:[#allocation2] sm:$0xff]  ;;  %v611_v1 = vld [vmem:[#allocation2 + $0x8] sm:$0xff]  ;;  %vm232_vm6 = vcmask 15360  }
  0x14   :  { %v613_v2 = vld [vmem:[#allocation2 + $0x40] sm:$0xff]  ;;  %v51_v3 = vadd.f32 %v611_v1, %v609_v0  ;;  %v617_v4 = vld [vmem:[#allocation2 + $0x48] sm:$0xff]  ;;  %v619_v5 = vld [vmem:[#allocation2 + $0x10] sm:$0xff] }
  0x15   :  { %v621_v6 = vld [vmem:[#allocation2 + $0x18] sm:$0xff]  ;;  %v63_v7 = vadd.f32 %v617_v4, %v613_v2  ;;  %v625_v8 = vld [vmem:[#allocation2 + $0x50] sm:$0xff]  ;;  %v633_v12 = vld [vmem:[#allocation2 + $0x20] sm:$0xff] }
  0x16   :  { %v627_v9 = vld [vmem:[#allocation2 + $0x58] sm:$0xff]  ;;  %52 = vadd.xlane.f32.xlu0 %v51_v3  ;;  %v54_v10 = vadd.f32 %v621_v6, %v619_v5  ;;  %v635_v13 = vld [vmem:[#allocation2 + $0x28] sm:$0xff]  ;;  %v637_v14 = vld [vmem:[#allocation2 + $0x60] sm:$0xff] }
  0x17   :  { %64 = vadd.xlane.f32.xlu1 %v63_v7  ;;  %v66_v11 = vadd.f32 %v627_v9, %v625_v8  ;;  %v639_v15 = vld [vmem:[#allocation2 + $0x68] sm:$0xff]  ;;  %v57_v16 = vadd.f32 %v635_v13, %v633_v12  ;;  %v645_v18 = vld [vmem:[#allocation2 + $0x30] sm:$0xff]  ;;  %v647_v19 = vld [vmem:[#allocation2 + $0x38] sm:$0xff] }
  0x18   :  { %v69_v17 = vadd.f32 %v639_v15, %v637_v14  ;;  %v649_v20 = vld [vmem:[#allocation2 + $0x70] sm:$0xff]  ;;  %v651_v21 = vld [vmem:[#allocation2 + $0x78] sm:$0xff]  ;;  %v60_v22 = vadd.f32 %v647_v19, %v645_v18 }
  0x19   :  { %v72_v23 = vadd.f32 %v651_v21, %v649_v20 }
  0x1a   :  { %55 = vadd.xlane.f32.xlu0 %v54_v10 }
  0x1b   :  { %67 = vadd.xlane.f32.xlu1 %v66_v11 }
  0x1e   :  { %58 = vadd.xlane.f32.xlu0 %v57_v16 }
  0x1f   :  { %70 = vadd.xlane.f32.xlu1 %v69_v17 }
  0x22   :  { %61 = vadd.xlane.f32.xlu0 %v60_v22 }
  0x23   :  { %73 = vadd.xlane.f32.xlu1 %v72_v23 }
  0xa3   :  { %v53_v24 = vpop.xlane.xlu0 %52 }
  0xa4   :  { %v657_v25 = vmul.f32 0.00390625, %v53_v24  ;;  %v65_v26 = vpop.xlane.xlu1 %64 }
  0xa5   :  { %v659_v27 = vmul.f32 0.00390625, %v65_v26 }
  0xa6   :  { %v83_v28 = vsub.f32 %v609_v0, %v657_v25  ;;  %v84_v29 = vsub.f32 %v611_v1, %v657_v25 }
  0xa7   :  { %v56_v30 = vpop.xlane.xlu0 %55  ;;  %v91_v31 = vsub.f32 %v613_v2, %v659_v27  ;;  %v92_v32 = vsub.f32 %v617_v4, %v659_v27 }
  0xa8   :  { %v669_v33 = vmul.f32 0.00390625, %v56_v30  ;;  %v68_v34 = vpop.xlane.xlu1 %67  ;;  %v99_v35 = vmul.f32 %v83_v28, %v83_v28  ;;  %v100_v36 = vmul.f32 %v84_v29, %v84_v29 }
  0xa9   :  { %v671_v37 = vmul.f32 0.00390625, %v68_v34  ;;  %v107_v38 = vmul.f32 %v91_v31, %v91_v31  ;;  %v108_v39 = vmul.f32 %v92_v32, %v92_v32 }
  0xaa   :  { %v115_v40 = vadd.f32 %v100_v36, %v99_v35  ;;  %v85_v41 = vsub.f32 %v619_v5, %v669_v33  ;;  %v86_v42 = vsub.f32 %v621_v6, %v669_v33 }
  0xab   :  { %v59_v43 = vpop.xlane.xlu0 %58  ;;  %v93_v44 = vsub.f32 %v625_v8, %v671_v37  ;;  %v94_v45 = vsub.f32 %v627_v9, %v671_v37  ;;  %v127_v48 = vadd.f32 %v108_v39, %v107_v38 }
  0xac   :  { %v681_v46 = vmul.f32 0.00390625, %v59_v43  ;;  %116 = vadd.xlane.f32.xlu0 %v115_v40  ;;  %v71_v47 = vpop.xlane.xlu1 %70  ;;  %v101_v49 = vmul.f32 %v85_v41, %v85_v41  ;;  %v102_v50 = vmul.f32 %v86_v42, %v86_v42 }
  0xad   :  { %v683_v51 = vmul.f32 0.00390625, %v71_v47  ;;  %v109_v52 = vmul.f32 %v93_v44, %v93_v44  ;;  %v110_v53 = vmul.f32 %v94_v45, %v94_v45 }
  0xae   :  { %v118_v54 = vadd.f32 %v102_v50, %v101_v49  ;;  %v87_v55 = vsub.f32 %v633_v12, %v681_v46  ;;  %v88_v56 = vsub.f32 %v635_v13, %v681_v46 }
  0xaf   :  { %v62_v57 = vpop.xlane.xlu0 %61  ;;  %v95_v58 = vsub.f32 %v637_v14, %v683_v51  ;;  %v96_v59 = vsub.f32 %v639_v15, %v683_v51  ;;  %v130_v62 = vadd.f32 %v110_v53, %v109_v52 }
  0xb0   :  { %v693_v60 = vmul.f32 0.00390625, %v62_v57  ;;  %128 = vadd.xlane.f32.xlu0 %v127_v48  ;;  %119 = vadd.xlane.f32.xlu1 %v118_v54  ;;  %v74_v61 = vpop.xlane.xlu1 %73  ;;  %v103_v63 = vmul.f32 %v87_v55, %v87_v55  ;;  %v104_v3 = vmul.f32 %v88_v56, %v88_v56 }
  0xb1   :  { %v695_v7 = vmul.f32 0.00390625, %v74_v61  ;;  %v111_v10 = vmul.f32 %v95_v58, %v95_v58  ;;  %v112_v11 = vmul.f32 %v96_v59, %v96_v59 }
  0xb2   :  { %v121_v16 = vadd.f32 %v104_v3, %v103_v63  ;;  %v89_v17 = vsub.f32 %v645_v18, %v693_v60  ;;  %v90_v22 = vsub.f32 %v647_v19, %v693_v60 }
  0xb3   :  { %v97_v23 = vsub.f32 %v649_v20, %v695_v7  ;;  %v98_v24 = vsub.f32 %v651_v21, %v695_v7  ;;  %v133_v26 = vadd.f32 %v112_v11, %v111_v10 }
  0xb4   :  { %131 = vadd.xlane.f32.xlu1 %v130_v62  ;;  %122 = vadd.xlane.f32.xlu0 %v121_v16  ;;  %v105_v28 = vmul.f32 %v89_v17, %v89_v17  ;;  %v106_v29 = vmul.f32 %v90_v22, %v90_v22 }
  0xb5   :  { %v113_v30 = vmul.f32 %v97_v23, %v97_v23  ;;  %v114_v31 = vmul.f32 %v98_v24, %v98_v24 }
  0xb6   :  { %v124_v32 = vadd.f32 %v106_v29, %v105_v28 }
  0xb7   :  { %v136_v34 = vadd.f32 %v114_v31, %v113_v30 }
  0xb8   :  { %134 = vadd.xlane.f32.xlu1 %v133_v26  ;;  %125 = vadd.xlane.f32.xlu0 %v124_v32  ;;  %v212_v26 = vld [vmem:[%s852_s1 + $0x8] sm:$0xff] }
  0xbc   :  { %137 = vadd.xlane.f32.xlu1 %v136_v34 }
 0x139   :  { %v117_v35 = vpop.xlane.xlu0 %116 }
 0x13a   :  { %v139_v36 = vmul.f32 0.00390625, %v117_v35  ;;  %v211_v35 = vld [vmem:[%s852_s1] sm:$0xff] }
 0x13c   :  { %463 = vrsqrt.f32 %v139_v36  ;;  %vm149_vm0 = vcmp.eq.f32.partialorder %v139_v36, inf  ;;  %vm151_vm1 = vcmp.eq.f32.partialorder %v139_v36, 0.0  ;;  %v152_v57 = vand.u32 2147483648, %v139_v36 }
 0x13d   :  { %v120_v38 = vpop.xlane.xlu1 %119  ;;  %v129_v39 = vpop.xlane.xlu0 %128 }
 0x13e   :  { %v140_v40 = vmul.f32 0.00390625, %v120_v38  ;;  %v143_v41 = vmul.f32 0.00390625, %v129_v39 }
 0x140   :  { %465 = vrsqrt.f32 %v140_v40  ;;  %vm156_vm2 = vcmp.eq.f32.partialorder %v140_v40, inf  ;;  %vm158_vm3 = vcmp.eq.f32.partialorder %v140_v40, 0.0  ;;  %v159_v62 = vand.u32 2147483648, %v140_v40 }
 0x141   :  { %467 = vrsqrt.f32 %v143_v41  ;;  %v132_v42 = vpop.xlane.xlu1 %131  ;;  %v123_v43 = vpop.xlane.xlu0 %122  ;;  %vm177_vm4 = vcmp.eq.f32.partialorder %v143_v41, inf  ;;  %vm179_vm5 = vcmp.eq.f32.partialorder %v143_v41, 0.0  ;;  %v180_v3 = vand.u32 2147483648, %v143_v41 }
 0x142   :  { %v144_v44 = vmul.f32 0.00390625, %v132_v42  ;;  %v705_v45 = vmul.f32 0.00390625, %v123_v43 }
 0x144   :  { %469 = vrsqrt.f32 %v144_v44  ;;  %vm184_vm7 = vcmp.eq.f32.partialorder %v144_v44, inf  ;;  %vm186_vm8 = vcmp.eq.f32.partialorder %v144_v44, 0.0  ;;  %v187_v23 = vand.u32 2147483648, %v144_v44 }
 0x145   :  { %471 = vrsqrt.f32 %v705_v45  ;;  %v135_v47 = vpop.xlane.xlu1 %134  ;;  %v126_v48 = vpop.xlane.xlu0 %125  ;;  %vm163_vm9 = vcmp.eq.f32.partialorder %v705_v45, inf  ;;  %vm165_vm10 = vcmp.eq.f32.partialorder %v705_v45, 0.0  ;;  %v166_v30 = vand.u32 2147483648, %v705_v45 }
 0x146   :  { %v464_v49 = vpop.eup %463  ;;  %v708_v50 = vmul.f32 0.00390625, %v135_v47  ;;  %v710_v52 = vmul.f32 0.00390625, %v126_v48  ;;  %v213_v47 = vld [vmem:[%s852_s1 + $0x10] sm:$0xff] }
 0x147   :  { %v148_v53 = vmul.f32 %v464_v49, %v139_v36 }
 0x148   :  { %473 = vrsqrt.f32 %v708_v50  ;;  %vm191_vm11 = vcmp.eq.f32.partialorder %v708_v50, inf  ;;  %vm193_vm12 = vcmp.eq.f32.partialorder %v708_v50, 0.0  ;;  %vm170_vm13 = vcmp.eq.f32.partialorder %v710_v52, inf }
 0x149   :  { %475 = vrsqrt.f32 %v710_v52  ;;  %v138_v54 = vpop.xlane.xlu1 %137  ;;  %v150_v56 = vsel %vm149_vm0, %v139_v36, %v148_v53  ;;  %vm172_vm14 = vcmp.eq.f32.partialorder %v710_v52, 0.0 }
 0x14a   :  { %v466_v55 = vpop.eup %465  ;;  %v714_v58 = vmul.f32 0.00390625, %v138_v54  ;;  %v153_v10 = vsel %vm151_vm1, %v152_v57, %v150_v56 }
 0x14b   :  { %v468_v59 = vpop.eup %467  ;;  %v155_v61 = vmul.f32 %v466_v55, %v140_v40  ;;  %v203_v31 = vadd.f32 %v153_v10, %v657_v25  ;;  %v173_v55 = vand.u32 2147483648, %v710_v52 }
 0x14c   :  { %v176_v63 = vmul.f32 %v468_v59, %v143_v41  ;;  %477 = vrsqrt.f32 %v714_v58  ;;  %vm198_vm15 = vcmp.eq.f32.partialorder %v714_v58, inf  ;;  %vm200_vm0 = vcmp.eq.f32.partialorder %v714_v58, 0.0 }
 0x14d   :  { %v157_v11 = vsel %vm156_vm2, %v140_v40, %v155_v61  ;;  %v224_v49 = vmul.f32 %v211_v35, %v203_v31 }
 0x14e   :  { %v470_v16 = vpop.eup %469  ;;  %v160_v17 = vsel %vm158_vm3, %v159_v62, %v157_v11  ;;  %v178_v22 = vsel %vm177_vm4, %v143_v41, %v176_v63  ;;  %v214_v63 = vld [vmem:[%s852_s1 + $0x18] sm:$0xff] }
 0x14f   :  { %v472_v24 = vpop.eup %471  ;;  %v204_v28 = vadd.f32 %v160_v17, %v669_v33  ;;  %v183_v29 = vmul.f32 %v470_v16, %v144_v44  ;;  %v181_v32 = vsel %vm179_vm5, %v180_v3, %v178_v22  ;;  %v194_v33 = vand.u32 2147483648, %v708_v50 }
 0x150   :  { %v162_v34 = vmul.f32 %v472_v24, %v705_v45  ;;  %v207_v42 = vadd.f32 %v181_v32, %v659_v27  ;;  %v233_v11 = vsel %vm232_vm6, %v224_v49, 0.0  ;;  %v201_v16 = vand.u32 2147483648, %v714_v58 }
 0x151   :  { %v185_v36 = vsel %vm184_vm7, %v144_v44, %v183_v29  ;;  %v225_v25 = vmul.f32 %v212_v26, %v204_v28 }
 0x152   :  { %v474_v38 = vpop.eup %473  ;;  %v188_v39 = vsel %vm186_vm8, %v187_v23, %v185_v36  ;;  %v164_v40 = vsel %vm163_vm9, %v705_v45, %v162_v34  ;;  %v228_v61 = vmul.f32 %v211_v35, %v207_v42 }
 0x153   :  { %v476_v41 = vpop.eup %475  ;;  %v208_v43 = vadd.f32 %v188_v39, %v671_v37  ;;  %v167_v48 = vsel %vm165_vm10, %v166_v30, %v164_v40  ;;  %v190_v44 = vmul.f32 %v474_v38, %v708_v50  ;;  %v234_v45 = vsel %vm232_vm6, %v225_v25, 0.0 }
 0x154   :  { %v205_v53 = vadd.f32 %v167_v48, %v681_v46  ;;  %v169_v54 = vmul.f32 %v476_v41, %v710_v52  ;;  %v235_v24 = vadd.f32 %v234_v45, %v233_v11  ;;  %v246_v28 = vsel %vm232_vm6, %v228_v61, 0.0  ;;  %v217_v45 = vld [vmem:[%s854_s3 + $0x8] sm:$0xff]  ;;  %v219_v61 = vld [vmem:[%s854_s3 + $0x18] sm:$0xff] }
 0x155   :  { %v229_v56 = vmul.f32 %v212_v26, %v208_v43  ;;  %v192_v27 = vsel %vm191_vm11, %v708_v50, %v190_v44  ;;  %v263_v41 = vlaneseq  ;;  %v215_v44 = vld [vmem:[%s853_s2] sm:$0x1] }
 0x156   :  { %v478_v37 = vpop.eup %477  ;;  %v226_v57 = vmul.f32 %v213_v47, %v205_v53  ;;  %v195_v46 = vsel %vm193_vm12, %v194_v33, %v192_v27  ;;  %v171_v59 = vsel %vm170_vm13, %v710_v52, %v169_v54 }
 0x157   :  { %v209_v62 = vadd.f32 %v195_v46, %v683_v51  ;;  %v174_v3 = vsel %vm172_vm14, %v173_v55, %v171_v59  ;;  %v197_v10 = vmul.f32 %v478_v37, %v714_v58  ;;  %v247_v22 = vsel %vm232_vm6, %v229_v56, 0.0 }
 0x158   :  { %v206_v50 = vadd.f32 %v174_v3, %v693_v60  ;;  %v236_v17 = vsel %vm232_vm6, %v226_v57, 0.0  ;;  %v248_v32 = vadd.f32 %v247_v22, %v246_v28  ;;  %v264_v48 = vshrl.u32 %v263_v41, 7  ;;  %v216_v57 = vld [vmem:[%s854_s3] sm:$0xff] }
 0x159   :  { %v230_v51 = vmul.f32 %v213_v47, %v209_v62  ;;  %v199_v23 = vsel %vm198_vm15, %v714_v58, %v197_v10  ;;  %v237_v29 = vadd.f32 %v236_v17, %v235_v24  ;;  %v218_v62 = vld [vmem:[%s854_s3 + $0x10] sm:$0xff] }
 0x15a   :  { %v227_v52 = vmul.f32 %v214_v63, %v206_v50  ;;  %v202_v26 = vsel %vm200_vm0, %v201_v16, %v199_v23  ;;  %v265_v56 = vsub.s32 0, %v264_v48 }
 0x15b   :  { %v210_v60 = vadd.f32 %v202_v26, %v695_v7  ;;  %v249_v30 = vsel %vm232_vm6, %v230_v51, 0.0 }
 0x15c   :  { %v238_v31 = vsel %vm232_vm6, %v227_v52, 0.0  ;;  %v250_v36 = vadd.f32 %v249_v30, %v248_v32  ;;  %v562_v32 = vmov 0  }
 0x15d   :  { %v231_v34 = vmul.f32 %v214_v63, %v210_v60  ;;  %v239_v35 = vadd.f32 %v238_v31, %v237_v29  ;;  %462 = vset.pattern.permute.xlu1 %v562_v32  ;;  %461 = vset.pattern.permute.xlu0 %v562_v32 }
 0x15f   :  { %v240_v33 = vrot.slane %v239_v35, 4  ;;  %v251_v38 = vsel %vm232_vm6, %v231_v34, 0.0  ;;  %v221_v34 = vld [vmem:[%s855_s4 + $0x8] sm:$0xff] }
 0x160   :  { %v252_v25 = vadd.f32 %v251_v38, %v250_v36 }
 0x161   :  { %v241_v39 = vadd.f32 %v240_v33, %v239_v35  ;;  %v220_v35 = vld [vmem:[%s855_s4] sm:$0xff] }
 0x162   :  { %v253_v58 = vrot.slane %v252_v25, 4 }
 0x163   :  { %v242_v40 = vrot.slane %v241_v39, 2 }
 0x164   :  { %v254_v42 = vadd.f32 %v253_v58, %v252_v25  ;;  %v222_v58 = vld [vmem:[%s855_s4 + $0x10] sm:$0xff] }
 0x165   :  { %v243_v43 = vadd.f32 %v242_v40, %v241_v39  ;;  %v223_v39 = vld [vmem:[%s855_s4 + $0x18] sm:$0xff]  ;;  %s563_s4 = smov [#allocation5]  }
 0x166   :  { %v255_v7 = vrot.slane %v254_v42, 2  ;;  %s436_s6 = sshll.u32 %s563_s4, 4  ;;  %s437_s6 = int_to_ptr.vmem [resolvable:$true] %s436_s6 }
 0x167   :  { %v244_v47 = vrot.slane %v243_v43, 1  ;;  %s533_s0 = scalar_lea.vmem %s437_s6, 2048  ;;  %p538_p9 = scmp.lt.s32.totalorder %s437_s6, %s437_s6 }
 0x168   :  { %v256_v49 = vadd.f32 %v255_v7, %v254_v42  ;;  %p534_p8 = scmp.ne.s32.totalorder %s437_s6, %s533_s0  ;;  %p539_p10 = scmp.lt.s32.totalorder %s533_s0, %s533_s0 }
 0x169   :  { %v245_v53 = vadd.f32 %v244_v47, %v243_v43 }
 0x16a   :  { %v257_v54 = vrot.slane %v256_v49, 1  ;;  %p540_p11 = por %p539_p10, %p538_p9 }
 0x16b   :  { %v259_v55 = vadd.f32 %v245_v53, %v215_v44 }
 0x16c   :  { %v258_v27 = vadd.f32 %v257_v54, %v256_v49  ;;  %p541_p12 = pnand %p540_p11, %p534_p8 }
 0x16d   :  { %v261_v37 = vmax.f32 %v259_v55, 0.0 }
 0x16e   :  { %v260_v46 = vadd.f32 %v258_v27, %v215_v44 }
 0x16f   :  { %v266_v59 = vrot.slane %v261_v37, %v265_v56 }
 0x170   :  { %v262_v63 = vmax.f32 %v260_v46, 0.0 }
 0x171   :  { %v272_v3 = vmul.f32 %v266_v59, %v217_v45  ;;  %v271_v10 = vmul.f32 %v266_v59, %v216_v57  ;;  %v274_v11 = vmul.f32 %v266_v59, %v219_v61  ;;  %v273_v17 = vmul.f32 %v266_v59, %v218_v62 }
 0x172   :  { %v270_v22 = vrot.slane %v262_v63, %v265_v56 }
 0x173   :  { %v282_v50 = vsel %vm232_vm6, %v272_v3, 0.0  ;;  %v279_v16 = vsel %vm232_vm6, %v271_v10, 0.0  ;;  %v288_v51 = vsel %vm232_vm6, %v274_v11, 0.0  ;;  %v285_v23 = vsel %vm232_vm6, %v273_v17, 0.0 }
 0x174   :  { %283 = vadd.xlane.f32.xlu1 %v282_v50  ;;  %280 = vadd.xlane.f32.xlu0 %v279_v16  ;;  %v276_v24 = vmul.f32 %v270_v22, %v217_v45  ;;  %v275_v52 = vmul.f32 %v270_v22, %v216_v57  ;;  %v278_v60 = vmul.f32 %v270_v22, %v219_v61 }
 0x175   :  { %v277_v29 = vmul.f32 %v270_v22, %v218_v62 }
 0x176   :  { %v294_v26 = vsel %vm232_vm6, %v276_v24, 0.0  ;;  %v291_v28 = vsel %vm232_vm6, %v275_v52, 0.0  ;;  %v300_v30 = vsel %vm232_vm6, %v278_v60, 0.0 }
 0x177   :  { %v297_v31 = vsel %vm232_vm6, %v277_v29, 0.0 }
 0x178   :  { %289 = vadd.xlane.f32.xlu1 %v288_v51  ;;  %286 = vadd.xlane.f32.xlu0 %v285_v23 }
 0x17c   :  { %295 = vadd.xlane.f32.xlu1 %v294_v26  ;;  %292 = vadd.xlane.f32.xlu0 %v291_v28 }
 0x180   :  { %301 = vadd.xlane.f32.xlu1 %v300_v30  ;;  %298 = vadd.xlane.f32.xlu0 %v297_v31 }
 0x201   :  { %v284_v36 = vpop.xlane.xlu1 %283  ;;  %v281_v33 = vpop.xlane.xlu0 %280 }
 0x202   :  { %v304_v38 = vadd.f32 %v284_v36, %v221_v34  ;;  %v303_v25 = vadd.f32 %v281_v33, %v220_v35 }
 0x204   :  { %v449_v40 = vmul.f32 -1.442695, %v304_v38  ;;  %v448_v41 = vmul.f32 -1.442695, %v303_v25 }
 0x205   :  { %v290_v42 = vpop.xlane.xlu1 %289  ;;  %v287_v43 = vpop.xlane.xlu0 %286 }
 0x206   :  { %479 = vpow2.f32 %v449_v40  ;;  %v306_v7 = vadd.f32 %v290_v42, %v223_v39  ;;  %v305_v47 = vadd.f32 %v287_v43, %v222_v58 }
 0x207   :  { %481 = vpow2.f32 %v448_v41 }
 0x208   :  { %v451_v48 = vmul.f32 -1.442695, %v306_v7  ;;  %v450_v44 = vmul.f32 -1.442695, %v305_v47 }
 0x209   :  { %v296_v49 = vpop.xlane.xlu1 %295  ;;  %v293_v53 = vpop.xlane.xlu0 %292 }
 0x20a   :  { %483 = vpow2.f32 %v451_v48  ;;  %v308_v54 = vadd.f32 %v296_v49, %v221_v34  ;;  %v307_v55 = vadd.f32 %v293_v53, %v220_v35 }
 0x20b   :  { %485 = vpow2.f32 %v450_v44 }
 0x20c   :  { %v452_v56 = vmul.f32 -1.442695, %v307_v55  ;;  %v453_v37 = vmul.f32 -1.442695, %v308_v54 }
 0x20d   :  { %v299_v27 = vpop.xlane.xlu0 %298  ;;  %v302_v46 = vpop.xlane.xlu1 %301 }
 0x20e   :  { %487 = vpow2.f32 %v452_v56  ;;  %v309_v45 = vadd.f32 %v299_v27, %v222_v58  ;;  %v310_v63 = vadd.f32 %v302_v46, %v223_v39 }
 0x20f   :  { %489 = vpow2.f32 %v453_v37 }
 0x210   :  { %v480_v57 = vpop.eup %479  ;;  %v454_v3 = vmul.f32 -1.442695, %v309_v45  ;;  %v455_v16 = vmul.f32 -1.442695, %v310_v63 }
 0x211   :  { %v482_v59 = vpop.eup %481  ;;  %v336_v61 = vadd.f32 1.0, %v480_v57 }
 0x212   :  { %v335_v62 = vadd.f32 1.0, %v482_v59 }
 0x213   :  { %491 = vrcp.f32 %v336_v61 }
 0x214   :  { %v484_v10 = vpop.eup %483  ;;  %493 = vrcp.f32 %v335_v62 }
 0x215   :  { %v486_v11 = vpop.eup %485  ;;  %495 = vpow2.f32 %v454_v3  ;;  %v338_v17 = vadd.f32 1.0, %v484_v10 }
 0x216   :  { %v337_v50 = vadd.f32 1.0, %v486_v11 }
 0x218   :  { %497 = vrcp.f32 %v337_v50  ;;  %v488_v22 = vpop.eup %487 }
 0x219   :  { %499 = vpow2.f32 %v455_v16  ;;  %v490_v51 = vpop.eup %489  ;;  %v339_v23 = vadd.f32 1.0, %v488_v22 }
 0x21a   :  { %501 = vrcp.f32 %v338_v17  ;;  %v340_v26 = vadd.f32 1.0, %v490_v51 }
 0x21b   :  { %503 = vrcp.f32 %v339_v23 }
 0x21c   :  { %505 = vrcp.f32 %v340_v26 }
 0x21d   :  { %v492_v24 = vpop.eup %491 }
 0x21e   :  { %v494_v52 = vpop.eup %493  ;;  %366 = vperm.xlu1 %462, %v492_v24  }
 0x21f   :  { %361 = vperm.xlu0 %461, %v494_v52   ;;  %v496_v28 = vpop.eup %495 }
 0x220   :  { %v341_v29 = vadd.f32 1.0, %v496_v28 }
 0x222   :  { %v498_v60 = vpop.eup %497  ;;  %507 = vrcp.f32 %v341_v29 }
 0x223   :  { %371 = vperm.xlu1 %462, %v498_v60   ;;  %v500_v30 = vpop.eup %499 }
 0x224   :  { %v502_v31 = vpop.eup %501  ;;  %v342_v32 = vadd.f32 1.0, %v500_v30 }
 0x225   :  { %v504_v34 = vpop.eup %503 }
 0x226   :  { %509 = vrcp.f32 %v342_v32  ;;  %v506_v35 = vpop.eup %505 }
 0x227   :  { %376 = vperm.xlu1 %462, %v502_v31  }
 0x22b   :  { %381 = vperm.xlu1 %462, %v504_v34  }
 0x22c   :  { %v508_v36 = vpop.eup %507 }
 0x22f   :  { %386 = vperm.xlu1 %462, %v506_v35  }
 0x230   :  { %v510_v33 = vpop.eup %509 }
 0x233   :  { %391 = vperm.xlu1 %462, %v508_v36  }
 0x237   :  { %396 = vperm.xlu1 %462, %v510_v33  }
 0x29d   :  { %v367_v38 = vpop.permute.xlu1 %366 }
 0x29e   :  { %v401_v25 = vmul.f32 %v367_v38, %v619_v5  ;;  %v402_v39 = vmul.f32 %v367_v38, %v621_v6  ;;  %v362_v58 = vpop.permute.xlu0 %361 }
 0x29f   :  { %v399_v40 = vmul.f32 %v362_v58, %v609_v0  ;;  %v400_v41 = vmul.f32 %v362_v58, %v611_v1 }
 0x2a0   :  { %417 = vst [vmem:[#allocation5 + $0x10] sm:$0xff] %v401_v25  ;;  %418 = vst [vmem:[#allocation5 + $0x18] sm:$0xff] %v402_v39 }
 0x2a1   :  { %415 = vst [vmem:[#allocation5] sm:$0xff] %v399_v40  ;;  %416 = vst [vmem:[#allocation5 + $0x8] sm:$0xff] %v400_v41 }
 0x2a2   :  { %v372_v42 = vpop.permute.xlu1 %371 }
 0x2a3   :  { %v403_v43 = vmul.f32 %v372_v42, %v633_v12  ;;  %v404_v7 = vmul.f32 %v372_v42, %v635_v13 }
 0x2a5   :  { %419 = vst [vmem:[#allocation5 + $0x20] sm:$0xff] %v403_v43  ;;  %420 = vst [vmem:[#allocation5 + $0x28] sm:$0xff] %v404_v7 }
 0x2a6   :  { %v377_v47 = vpop.permute.xlu1 %376 }
 0x2a7   :  { %v405_v5 = vmul.f32 %v377_v47, %v645_v18  ;;  %v406_v6 = vmul.f32 %v377_v47, %v647_v19 }
 0x2a9   :  { %421 = vst [vmem:[#allocation5 + $0x30] sm:$0xff] %v405_v5  ;;  %422 = vst [vmem:[#allocation5 + $0x38] sm:$0xff] %v406_v6 }
 0x2aa   :  { %v382_v0 = vpop.permute.xlu1 %381 }
 0x2ab   :  { %v407_v1 = vmul.f32 %v382_v0, %v613_v2  ;;  %v408_v48 = vmul.f32 %v382_v0, %v617_v4 }
 0x2ad   :  { %423 = vst [vmem:[#allocation5 + $0x40] sm:$0xff] %v407_v1  ;;  %424 = vst [vmem:[#allocation5 + $0x48] sm:$0xff] %v408_v48 }
 0x2ae   :  { %v387_v44 = vpop.permute.xlu1 %386 }
 0x2af   :  { %v409_v12 = vmul.f32 %v387_v44, %v625_v8  ;;  %v410_v13 = vmul.f32 %v387_v44, %v627_v9 }
 0x2b1   :  { %425 = vst [vmem:[#allocation5 + $0x50] sm:$0xff] %v409_v12  ;;  %426 = vst [vmem:[#allocation5 + $0x58] sm:$0xff] %v410_v13 }
 0x2b2   :  { %v392_v49 = vpop.permute.xlu1 %391 }
 0x2b3   :  { %v411_v18 = vmul.f32 %v392_v49, %v637_v14  ;;  %v412_v19 = vmul.f32 %v392_v49, %v639_v15 }
 0x2b5   :  { %427 = vst [vmem:[#allocation5 + $0x60] sm:$0xff] %v411_v18  ;;  %428 = vst [vmem:[#allocation5 + $0x68] sm:$0xff] %v412_v19 }
 0x2b6   :  { %v397_v2 = vpop.permute.xlu1 %396 }
 0x2b7   :  { %v413_v4 = vmul.f32 %v397_v2, %v649_v20  ;;  %v414_v53 = vmul.f32 %v397_v2, %v651_v21 }
 0x2b9   :  { %429 = vst [vmem:[#allocation5 + $0x70] sm:$0xff] %v413_v4  ;;  %430 = vst [vmem:[#allocation5 + $0x78] sm:$0xff] %v414_v53 }
 0x2ba   :  { %544 = shalt.err (!%p541_p12)
}
 0x2bb   :  { %s545_s9 = scalar_lea.hbm %s856_s5, 2048 }
 0x2bc   :  { %p546_p13 = scmp.ne.s32.totalorder %s856_s5, %s545_s9  ;;  %p549_p0 = scmp.lt.u32.totalorder %s545_s9, %s856_s5 }
 0x2be   :  { %p551_p1 = pnand %p549_p0, %p546_p13 }
 0x2c0   :  { %554 = shalt.err (!%p551_p1)
}
 0x2c1   :  { %442 = dma.vmem_to_hbm [thread:$0]  %s437_s6, 2048, %s856_s5, [#allocation4], %s560_s28, %s560_s28, %s561_s29  }
 0x2c2   :  { %557 = dma.done.wait [#allocation4], 2048  }
 0x2c3   :  { %558 = vsyncadd [#allocation4], 4294965248 }
 0x2c4   :  { %446 = vsyncpa [#allocation3], 1 }
 0x2c5   :  { %447 = vsyncpa [#allocation4], 1 }

</bundles_post_ra>
